<compile_context>
chip_gen: v6e
topology: v6e:2x2x1
jax: 0.10.0
libtpu: 0.0.40
codegen_flags: <defaults>
</compile_context>

<pallas_src>
import jax
import jax.numpy as jnp
import numpy as np
from jax.experimental import pallas as pl
from jax.experimental.pallas import tpu as pltpu


def _round_up(x, m):
    return ((x + m - 1) // m) * m


def _channels_mlp_kernel(x_ref, *refs):
    """Single (grid-less) invocation: the three channel MLP chains, unrolled.

    x_ref : (3, Bp, Dp)  f32   padded, per-channel flattened inputs
    refs  : W0, b0, W1, b1, ..., Wlast, blast, out_ref
            Wi: (3, d_in_p, d_out_p)  bf16 or f32 (streamed dtype)
            bi: (3, 1, d_out_p)       f32
    out_ref: (3, Bp, Pp) f32
    """
    out_ref = refs[-1]
    params = refs[:-1]
    n_layers = len(params) // 2

    for c in range(3):                                    # unrolled channels
        h = x_ref[c]                                      # (Bp, Dp) f32
        for i in range(n_layers):
            w = params[2 * i][c]                          # (d_in_p, d_out_p)
            b = params[2 * i + 1][c]                      # (1, d_out_p) f32
            # bf16 (or f32) MXU matmul, f32 accumulation, f32 epilogue.
            acc = jnp.dot(h.astype(w.dtype), w,
                          preferred_element_type=jnp.float32) + b
            if i < n_layers - 1:
                h = jnp.maximum(acc, 0.0)                 # F.relu (hidden layers)
            else:
                h = jnp.tanh(acc)                         # torch.tanh (last layer)
        out_ref[c] = h                                    # lane-dense (Bp, Pp) store


def matrix_channeled_forward(batch, params, *, use_bf16=True):
    """batch: (B, 6, L, L) float32.
    params: list of (W, b) per layer, W: (3, d_in, d_out), b: (3, d_out)."""
    B, six, L, _ = batch.shape
    assert six == 6
    P = L * L
    Din = 4 * P

    # Pad M (sublanes) to >=8 for f32, K/N (lanes) to multiples of 128.
    Bp = max(8, _round_up(B, 8))
    Dp = _round_up(Din, 128)
    Pp = _round_up(P, 128)

    # Same channel groupings as the PyTorch forward (cheap glue in plain JAX;
    # duplication accepted while B*L*L is tiny relative to weight bytes).
    groups = ((0, 1, 2, 3), (2, 3, 4, 5), (0, 1, 4, 5))
    X = jnp.stack([batch[:, list(g), :, :].reshape(B, Din) for g in groups],
                  axis=0)                                 # (3, B, Din)
    X = jnp.pad(X, ((0, 0), (0, Bp - B), (0, Dp - Din)))  # (3, Bp, Dp), zero pad

    w_dtype = jnp.bfloat16 if use_bf16 else jnp.float32

    flat_params = []
    layer_dims = []
    n_layers = len(params)
    for i, (W, b) in enumerate(params):
        _, d_in, d_out = W.shape
        d_in_p = _round_up(d_in, 128)
        d_out_p = _round_up(d_out, 128)
        # Zero padding keeps padded hidden units exactly 0 through bias+ReLU,
        # so they contribute nothing to the next layer; padded output columns
        # are tanh(0)=0 and sliced off below.
        Wp = jnp.pad(W, ((0, 0), (0, d_in_p - d_in), (0, d_out_p - d_out)))
        bp = jnp.pad(b, ((0, 0), (0, d_out_p - d_out)))
        flat_params += [Wp.astype(w_dtype),
                        bp.reshape(3, 1, d_out_p).astype(jnp.float32)]
        layer_dims.append((d_in_p, d_out_p))

    # Advisory cost estimate so XLA can overlap the wrapper glue with the call.
    flops = 2 * 3 * Bp * sum(di * do for di, do in layer_dims)
    transcendentals = 3 * Bp * Pp                          # tanh on the last layer
    bytes_accessed = int(X.size * X.dtype.itemsize
                         + sum(p.size * p.dtype.itemsize for p in flat_params)
                         + 3 * Bp * Pp * 4)

    vmem_spec = pl.BlockSpec(memory_space=pltpu.MemorySpace.VMEM)

    out = pl.pallas_call(
        _channels_mlp_kernel,
        out_shape=jax.ShapeDtypeStruct((3, Bp, Pp), jnp.float32),
        in_specs=[vmem_spec] * (1 + len(flat_params)),
        out_specs=vmem_spec,
        compiler_params=pltpu.CompilerParams(
            vmem_limit_bytes=64 * 1024 * 1024),
        cost_estimate=pl.CostEstimate(flops=flops,
                                      transcendentals=transcendentals,
                                      bytes_accessed=bytes_accessed),
    )(X, *flat_params)

    # Strip padding, then (3, B, P) -> (B, 3, P) -> (B, 3, L, L); row-major
    # pixel order matches torch's .view(-1, L, L) + torch.stack(..., dim=1).
    out = out[:, :B, :P]
    return jnp.transpose(out, (1, 0, 2)).reshape(B, 3, L, L)


def init_params(key, L, layers_size):
    """Deterministic synthetic per-channel MLP weights (PyTorch-like uniform init)."""
    P = L * L
    dims = [4 * P] + list(layers_size) + [P]
    params = []
    for i in range(len(dims) - 1):
        d_in, d_out = dims[i], dims[i + 1]
        key, kw, kb = jax.random.split(key, 3)
        bound = 1.0 / (d_in ** 0.5)
        W = jax.random.uniform(kw, (3, d_in, d_out), jnp.float32, -bound, bound)
        b = jax.random.uniform(kb, (3, d_out), jnp.float32, -bound, bound)
        params.append((W, b))
    return params


def reference_forward(batch, params):
    """Pure-JAX reference mirroring the PyTorch module semantics (f32)."""
    B, _, L, _ = batch.shape
    Din = 4 * L * L
    groups = ((0, 1, 2, 3), (2, 3, 4, 5), (0, 1, 4, 5))
    n = len(params)
    outs = []
    for c, g in enumerate(groups):
        h = batch[:, list(g), :, :].reshape(B, Din)
        for i, (W, b) in enumerate(params):
            h = h @ W[c] + b[c]
            h = jnp.maximum(h, 0.0) if i < n - 1 else jnp.tanh(h)
        outs.append(h.reshape(B, L, L))
    return jnp.stack(outs, axis=1)                        # (B, 3, L, L)


if __name__ == "__main__":
    B, L = 2, 4                 # matrix_length = 4 -> per-channel input dim 4*16 = 64
    layers_size = (32, 16)      # two hidden layers; final layer is L*L = 16 wide

    key = jax.random.PRNGKey(0)
    kx, kp = jax.random.split(key)
    batch = jax.random.normal(kx, (B, 6, L, L), dtype=jnp.float32)
    params = init_params(kp, L, layers_size)

    ref = reference_forward(batch, params)

    # 1) f32 streaming path: must match the module semantics tightly.
    out_f32 = jax.block_until_ready(
        matrix_channeled_forward(batch, params, use_bf16=False))
    assert out_f32.shape == (B, 3, L, L), out_f32.shape
    np.testing.assert_allclose(np.asarray(out_f32), np.asarray(ref),
                               rtol=1e-5, atol=1e-5)

    # 2) bf16 weight/LHS streaming (perf default): f32 accumulation, looser tol.
    out_bf16 = jax.block_until_ready(
        matrix_channeled_forward(batch, params, use_bf16=True))
    assert out_bf16.shape == (B, 3, L, L), out_bf16.shape
    np.testing.assert_allclose(np.asarray(out_bf16), np.asarray(ref),
                               rtol=1e-2, atol=2e-2)

    print("KERNEL_OK")
</pallas_src>

<mosaic_0001>
module attributes {stable_mosaic.version = 11 : i64} {
  func.func @_channels_mlp_kernel(%arg0: memref<3x8x128xf32, #tpu.memory_space<vmem>>, %arg1: memref<3x128x128xf32, #tpu.memory_space<vmem>>, %arg2: memref<3x1x128xf32, #tpu.memory_space<vmem>>, %arg3: memref<3x128x128xf32, #tpu.memory_space<vmem>>, %arg4: memref<3x1x128xf32, #tpu.memory_space<vmem>>, %arg5: memref<3x128x128xf32, #tpu.memory_space<vmem>>, %arg6: memref<3x1x128xf32, #tpu.memory_space<vmem>>, %arg7: memref<3x8x128xf32, #tpu.memory_space<vmem>>) attributes {dimension_semantics = [], scalar_prefetch = 0 : i64, scratch_operands = 0 : i64, tpu.core_type = #tpu.core_type<tc>} {
    %c0 = arith.constant 0 : index
    %c0_0 = arith.constant 0 : index
    %c0_1 = arith.constant 0 : index
    %0 = vector.load %arg0[%c0, %c0_0, %c0_1] : memref<3x8x128xf32, #tpu.memory_space<vmem>>, vector<1x8x128xf32>
    %1 = vector.shape_cast %0 : vector<1x8x128xf32> to vector<8x128xf32>
    %c0_2 = arith.constant 0 : index
    %c0_3 = arith.constant 0 : index
    %c0_4 = arith.constant 0 : index
    %2 = vector.load %arg1[%c0_2, %c0_3, %c0_4] : memref<3x128x128xf32, #tpu.memory_space<vmem>>, vector<1x128x128xf32>
    %3 = vector.shape_cast %2 : vector<1x128x128xf32> to vector<128x128xf32>
    %c0_5 = arith.constant 0 : index
    %c0_6 = arith.constant 0 : index
    %c0_7 = arith.constant 0 : index
    %4 = vector.load %arg2[%c0_5, %c0_6, %c0_7] : memref<3x1x128xf32, #tpu.memory_space<vmem>>, vector<1x1x128xf32>
    %5 = vector.shape_cast %4 : vector<1x1x128xf32> to vector<1x128xf32>
    %cst = arith.constant dense<0.000000e+00> : vector<8x128xf32>
    %6 = tpu.matmul %1, %3, %cst {dimension_numbers = #tpu.dot_dimension_numbers<[1], [0], [0], [1], [0, 0, 1, 1], [], []>} : vector<8x128xf32>, vector<128x128xf32>, vector<8x128xf32> -> vector<8x128xf32>
    %7 = vector.broadcast %5 : vector<1x128xf32> to vector<8x128xf32>
    %8 = arith.addf %6, %7 : vector<8x128xf32>
    %cst_8 = arith.constant 0.000000e+00 : f32
    %9 = vector.broadcast %cst_8 : f32 to vector<8x128xf32>
    %10 = arith.maximumf %8, %9 : vector<8x128xf32>
    %c0_9 = arith.constant 0 : index
    %c0_10 = arith.constant 0 : index
    %c0_11 = arith.constant 0 : index
    %11 = vector.load %arg3[%c0_9, %c0_10, %c0_11] : memref<3x128x128xf32, #tpu.memory_space<vmem>>, vector<1x128x128xf32>
    %12 = vector.shape_cast %11 : vector<1x128x128xf32> to vector<128x128xf32>
    %c0_12 = arith.constant 0 : index
    %c0_13 = arith.constant 0 : index
    %c0_14 = arith.constant 0 : index
    %13 = vector.load %arg4[%c0_12, %c0_13, %c0_14] : memref<3x1x128xf32, #tpu.memory_space<vmem>>, vector<1x1x128xf32>
    %14 = vector.shape_cast %13 : vector<1x1x128xf32> to vector<1x128xf32>
    %cst_15 = arith.constant dense<0.000000e+00> : vector<8x128xf32>
    %15 = tpu.matmul %10, %12, %cst_15 {dimension_numbers = #tpu.dot_dimension_numbers<[1], [0], [0], [1], [0, 0, 1, 1], [], []>} : vector<8x128xf32>, vector<128x128xf32>, vector<8x128xf32> -> vector<8x128xf32>
    %16 = vector.broadcast %14 : vector<1x128xf32> to vector<8x128xf32>
    %17 = arith.addf %15, %16 : vector<8x128xf32>
    %cst_16 = arith.constant 0.000000e+00 : f32
    %18 = vector.broadcast %cst_16 : f32 to vector<8x128xf32>
    %19 = arith.maximumf %17, %18 : vector<8x128xf32>
    %c0_17 = arith.constant 0 : index
    %c0_18 = arith.constant 0 : index
    %c0_19 = arith.constant 0 : index
    %20 = vector.load %arg5[%c0_17, %c0_18, %c0_19] : memref<3x128x128xf32, #tpu.memory_space<vmem>>, vector<1x128x128xf32>
    %21 = vector.shape_cast %20 : vector<1x128x128xf32> to vector<128x128xf32>
    %c0_20 = arith.constant 0 : index
    %c0_21 = arith.constant 0 : index
    %c0_22 = arith.constant 0 : index
    %22 = vector.load %arg6[%c0_20, %c0_21, %c0_22] : memref<3x1x128xf32, #tpu.memory_space<vmem>>, vector<1x1x128xf32>
    %23 = vector.shape_cast %22 : vector<1x1x128xf32> to vector<1x128xf32>
    %cst_23 = arith.constant dense<0.000000e+00> : vector<8x128xf32>
    %24 = tpu.matmul %19, %21, %cst_23 {dimension_numbers = #tpu.dot_dimension_numbers<[1], [0], [0], [1], [0, 0, 1, 1], [], []>} : vector<8x128xf32>, vector<128x128xf32>, vector<8x128xf32> -> vector<8x128xf32>
    %25 = vector.broadcast %23 : vector<1x128xf32> to vector<8x128xf32>
    %26 = arith.addf %24, %25 : vector<8x128xf32>
    %27 = math.tanh %26 : vector<8x128xf32>
    %c0_24 = arith.constant 0 : index
    %c0_25 = arith.constant 0 : index
    %c0_26 = arith.constant 0 : index
    %28 = vector.load %arg7[%c0_24, %c0_25, %c0_26] : memref<3x8x128xf32, #tpu.memory_space<vmem>>, vector<1x8x128xf32>
    %29 = vector.shape_cast %28 : vector<1x8x128xf32> to vector<8x128xf32>
    %30 = vector.shape_cast %27 : vector<8x128xf32> to vector<1x8x128xf32>
    tpu.vector_store %arg7[%c0_24, %c0_25, %c0_26], %30 {strides = array<i32>} : memref<3x8x128xf32, #tpu.memory_space<vmem>>, vector<1x8x128xf32>,
    %c1 = arith.constant 1 : index
    %c0_27 = arith.constant 0 : index
    %c0_28 = arith.constant 0 : index
    %31 = vector.load %arg0[%c1, %c0_27, %c0_28] : memref<3x8x128xf32, #tpu.memory_space<vmem>>, vector<1x8x128xf32>
    %32 = vector.shape_cast %31 : vector<1x8x128xf32> to vector<8x128xf32>
    %c1_29 = arith.constant 1 : index
    %c0_30 = arith.constant 0 : index
    %c0_31 = arith.constant 0 : index
    %33 = vector.load %arg1[%c1_29, %c0_30, %c0_31] : memref<3x128x128xf32, #tpu.memory_space<vmem>>, vector<1x128x128xf32>
    %34 = vector.shape_cast %33 : vector<1x128x128xf32> to vector<128x128xf32>
    %c1_32 = arith.constant 1 : index
    %c0_33 = arith.constant 0 : index
    %c0_34 = arith.constant 0 : index
    %35 = vector.load %arg2[%c1_32, %c0_33, %c0_34] : memref<3x1x128xf32, #tpu.memory_space<vmem>>, vector<1x1x128xf32>
    %36 = vector.shape_cast %35 : vector<1x1x128xf32> to vector<1x128xf32>
    %cst_35 = arith.constant dense<0.000000e+00> : vector<8x128xf32>
    %37 = tpu.matmul %32, %34, %cst_35 {dimension_numbers = #tpu.dot_dimension_numbers<[1], [0], [0], [1], [0, 0, 1, 1], [], []>} : vector<8x128xf32>, vector<128x128xf32>, vector<8x128xf32> -> vector<8x128xf32>
    %38 = vector.broadcast %36 : vector<1x128xf32> to vector<8x128xf32>
    %39 = arith.addf %37, %38 : vector<8x128xf32>
    %cst_36 = arith.constant 0.000000e+00 : f32
    %40 = vector.broadcast %cst_36 : f32 to vector<8x128xf32>
    %41 = arith.maximumf %39, %40 : vector<8x128xf32>
    %c1_37 = arith.constant 1 : index
    %c0_38 = arith.constant 0 : index
    %c0_39 = arith.constant 0 : index
    %42 = vector.load %arg3[%c1_37, %c0_38, %c0_39] : memref<3x128x128xf32, #tpu.memory_space<vmem>>, vector<1x128x128xf32>
    %43 = vector.shape_cast %42 : vector<1x128x128xf32> to vector<128x128xf32>
    %c1_40 = arith.constant 1 : index
    %c0_41 = arith.constant 0 : index
    %c0_42 = arith.constant 0 : index
    %44 = vector.load %arg4[%c1_40, %c0_41, %c0_42] : memref<3x1x128xf32, #tpu.memory_space<vmem>>, vector<1x1x128xf32>
    %45 = vector.shape_cast %44 : vector<1x1x128xf32> to vector<1x128xf32>
    %cst_43 = arith.constant dense<0.000000e+00> : vector<8x128xf32>
    %46 = tpu.matmul %41, %43, %cst_43 {dimension_numbers = #tpu.dot_dimension_numbers<[1], [0], [0], [1], [0, 0, 1, 1], [], []>} : vector<8x128xf32>, vector<128x128xf32>, vector<8x128xf32> -> vector<8x128xf32>
    %47 = vector.broadcast %45 : vector<1x128xf32> to vector<8x128xf32>
    %48 = arith.addf %46, %47 : vector<8x128xf32>
    %cst_44 = arith.constant 0.000000e+00 : f32
    %49 = vector.broadcast %cst_44 : f32 to vector<8x128xf32>
    %50 = arith.maximumf %48, %49 : vector<8x128xf32>
    %c1_45 = arith.constant 1 : index
    %c0_46 = arith.constant 0 : index
    %c0_47 = arith.constant 0 : index
    %51 = vector.load %arg5[%c1_45, %c0_46, %c0_47] : memref<3x128x128xf32, #tpu.memory_space<vmem>>, vector<1x128x128xf32>
    %52 = vector.shape_cast %51 : vector<1x128x128xf32> to vector<128x128xf32>
    %c1_48 = arith.constant 1 : index
    %c0_49 = arith.constant 0 : index
    %c0_50 = arith.constant 0 : index
    %53 = vector.load %arg6[%c1_48, %c0_49, %c0_50] : memref<3x1x128xf32, #tpu.memory_space<vmem>>, vector<1x1x128xf32>
    %54 = vector.shape_cast %53 : vector<1x1x128xf32> to vector<1x128xf32>
    %cst_51 = arith.constant dense<0.000000e+00> : vector<8x128xf32>
    %55 = tpu.matmul %50, %52, %cst_51 {dimension_numbers = #tpu.dot_dimension_numbers<[1], [0], [0], [1], [0, 0, 1, 1], [], []>} : vector<8x128xf32>, vector<128x128xf32>, vector<8x128xf32> -> vector<8x128xf32>
    %56 = vector.broadcast %54 : vector<1x128xf32> to vector<8x128xf32>
    %57 = arith.addf %55, %56 : vector<8x128xf32>
    %58 = math.tanh %57 : vector<8x128xf32>
    %c1_52 = arith.constant 1 : index
    %c0_53 = arith.constant 0 : index
    %c0_54 = arith.constant 0 : index
    %59 = vector.load %arg7[%c1_52, %c0_53, %c0_54] : memref<3x8x128xf32, #tpu.memory_space<vmem>>, vector<1x8x128xf32>
    %60 = vector.shape_cast %59 : vector<1x8x128xf32> to vector<8x128xf32>
    %61 = vector.shape_cast %58 : vector<8x128xf32> to vector<1x8x128xf32>
    tpu.vector_store %arg7[%c1_52, %c0_53, %c0_54], %61 {strides = array<i32>} : memref<3x8x128xf32, #tpu.memory_space<vmem>>, vector<1x8x128xf32>,
    %c2 = arith.constant 2 : index
    %c0_55 = arith.constant 0 : index
    %c0_56 = arith.constant 0 : index
    %62 = vector.load %arg0[%c2, %c0_55, %c0_56] : memref<3x8x128xf32, #tpu.memory_space<vmem>>, vector<1x8x128xf32>
    %63 = vector.shape_cast %62 : vector<1x8x128xf32> to vector<8x128xf32>
    %c2_57 = arith.constant 2 : index
    %c0_58 = arith.constant 0 : index
    %c0_59 = arith.constant 0 : index
    %64 = vector.load %arg1[%c2_57, %c0_58, %c0_59] : memref<3x128x128xf32, #tpu.memory_space<vmem>>, vector<1x128x128xf32>
    %65 = vector.shape_cast %64 : vector<1x128x128xf32> to vector<128x128xf32>
    %c2_60 = arith.constant 2 : index
    %c0_61 = arith.constant 0 : index
    %c0_62 = arith.constant 0 : index
    %66 = vector.load %arg2[%c2_60, %c0_61, %c0_62] : memref<3x1x128xf32, #tpu.memory_space<vmem>>, vector<1x1x128xf32>
    %67 = vector.shape_cast %66 : vector<1x1x128xf32> to vector<1x128xf32>
    %cst_63 = arith.constant dense<0.000000e+00> : vector<8x128xf32>
    %68 = tpu.matmul %63, %65, %cst_63 {dimension_numbers = #tpu.dot_dimension_numbers<[1], [0], [0], [1], [0, 0, 1, 1], [], []>} : vector<8x128xf32>, vector<128x128xf32>, vector<8x128xf32> -> vector<8x128xf32>
    %69 = vector.broadcast %67 : vector<1x128xf32> to vector<8x128xf32>
    %70 = arith.addf %68, %69 : vector<8x128xf32>
    %cst_64 = arith.constant 0.000000e+00 : f32
    %71 = vector.broadcast %cst_64 : f32 to vector<8x128xf32>
    %72 = arith.maximumf %70, %71 : vector<8x128xf32>
    %c2_65 = arith.constant 2 : index
    %c0_66 = arith.constant 0 : index
    %c0_67 = arith.constant 0 : index
    %73 = vector.load %arg3[%c2_65, %c0_66, %c0_67] : memref<3x128x128xf32, #tpu.memory_space<vmem>>, vector<1x128x128xf32>
    %74 = vector.shape_cast %73 : vector<1x128x128xf32> to vector<128x128xf32>
    %c2_68 = arith.constant 2 : index
    %c0_69 = arith.constant 0 : index
    %c0_70 = arith.constant 0 : index
    %75 = vector.load %arg4[%c2_68, %c0_69, %c0_70] : memref<3x1x128xf32, #tpu.memory_space<vmem>>, vector<1x1x128xf32>
    %76 = vector.shape_cast %75 : vector<1x1x128xf32> to vector<1x128xf32>
    %cst_71 = arith.constant dense<0.000000e+00> : vector<8x128xf32>
    %77 = tpu.matmul %72, %74, %cst_71 {dimension_numbers = #tpu.dot_dimension_numbers<[1], [0], [0], [1], [0, 0, 1, 1], [], []>} : vector<8x128xf32>, vector<128x128xf32>, vector<8x128xf32> -> vector<8x128xf32>
    %78 = vector.broadcast %76 : vector<1x128xf32> to vector<8x128xf32>
    %79 = arith.addf %77, %78 : vector<8x128xf32>
    %cst_72 = arith.constant 0.000000e+00 : f32
    %80 = vector.broadcast %cst_72 : f32 to vector<8x128xf32>
    %81 = arith.maximumf %79, %80 : vector<8x128xf32>
    %c2_73 = arith.constant 2 : index
    %c0_74 = arith.constant 0 : index
    %c0_75 = arith.constant 0 : index
    %82 = vector.load %arg5[%c2_73, %c0_74, %c0_75] : memref<3x128x128xf32, #tpu.memory_space<vmem>>, vector<1x128x128xf32>
    %83 = vector.shape_cast %82 : vector<1x128x128xf32> to vector<128x128xf32>
    %c2_76 = arith.constant 2 : index
    %c0_77 = arith.constant 0 : index
    %c0_78 = arith.constant 0 : index
    %84 = vector.load %arg6[%c2_76, %c0_77, %c0_78] : memref<3x1x128xf32, #tpu.memory_space<vmem>>, vector<1x1x128xf32>
    %85 = vector.shape_cast %84 : vector<1x1x128xf32> to vector<1x128xf32>
    %cst_79 = arith.constant dense<0.000000e+00> : vector<8x128xf32>
    %86 = tpu.matmul %81, %83, %cst_79 {dimension_numbers = #tpu.dot_dimension_numbers<[1], [0], [0], [1], [0, 0, 1, 1], [], []>} : vector<8x128xf32>, vector<128x128xf32>, vector<8x128xf32> -> vector<8x128xf32>
    %87 = vector.broadcast %85 : vector<1x128xf32> to vector<8x128xf32>
    %88 = arith.addf %86, %87 : vector<8x128xf32>
    %89 = math.tanh %88 : vector<8x128xf32>
    %c2_80 = arith.constant 2 : index
    %c0_81 = arith.constant 0 : index
    %c0_82 = arith.constant 0 : index
    %90 = vector.load %arg7[%c2_80, %c0_81, %c0_82] : memref<3x8x128xf32, #tpu.memory_space<vmem>>, vector<1x8x128xf32>
    %91 = vector.shape_cast %90 : vector<1x8x128xf32> to vector<8x128xf32>
    %92 = vector.shape_cast %89 : vector<8x128xf32> to vector<1x8x128xf32>
    tpu.vector_store %arg7[%c2_80, %c0_81, %c0_82], %92 {strides = array<i32>} : memref<3x8x128xf32, #tpu.memory_space<vmem>>, vector<1x8x128xf32>,
    return
  }
}

</mosaic_0001>

<bundles_post_ra>
// kernel: tpu_custom_call.1
= control target key start
LH: loop header
LB: loop body
LE: loop exit
PB: predicated region body
PF: predicated region fallthrough
CT: control target
= control target key end

     0   :  { %12 = vsyncpa [#allocation3], 0  ;;  %s1843_s0 = inlined_call_operand.hbm [shape: f32[3,8,128], index: 0, kind: input, shape index: {}]   ;;  %s1844_s1 = inlined_call_operand.hbm [shape: f32[3,128,128], index: 1, kind: input, shape index: {}]   ;;  %s1845_s2 = inlined_call_operand.vmem [shape: f32[3,1,128], index: 2, kind: input, shape index: {}]   ;;  %s1846_s3 = inlined_call_operand.hbm [shape: f32[3,128,128], index: 3, kind: input, shape index: {}]   ;;  %s1847_s4 = inlined_call_operand.vmem [shape: f32[3,1,128], index: 4, kind: input, shape index: {}]   ;;  %s1848_s5 = inlined_call_operand.hbm [shape: f32[3,128,128], index: 5, kind: input, shape index: {}]   ;;  %s1849_s6 = inlined_call_operand.vmem [shape: f32[3,1,128], index: 6, kind: input, shape index: {}]   ;;  %s1850_s7 = inlined_call_operand.hbm [shape: f32[3,8,128], index: 7, kind: output, shape index: {}]  }
   0x1   :  { %13 = vsyncpa [#allocation6], 0 }
   0x2   :  { %14 = vsyncpa [#allocation9], 0 }
   0x3   :  { %15 = vsyncpa [#allocation4], 0  ;;  %s1575_s24 = smov [#allocation5]   ;;  %s1576_s26 = smov [#allocation2]  }
   0x4   :  { %s33_s25 = sshll.u32 %s1575_s24, 4  ;;  %s21_s27 = sshll.u32 %s1576_s26, 4  ;;  %s34_s25 = int_to_ptr.vmem [resolvable:$true] %s33_s25  ;;  %s22_s27 = int_to_ptr.vmem [resolvable:$true] %s21_s27 }
   0x5   :  { %s1475_s28 = scalar_lea.vmem %s34_s25, 6144  ;;  %p1480_p1 = scmp.lt.s32.totalorder %s34_s25, %s34_s25 }
   0x6   :  { %p1476_p0 = scmp.ne.s32.totalorder %s34_s25, %s1475_s28  ;;  %p1481_p2 = scmp.lt.s32.totalorder %s1475_s28, %s1475_s28 }
   0x8   :  { %p1482_p3 = por %p1481_p2, %p1480_p1 }
   0xa   :  { %p1483_p4 = pnand %p1482_p3, %p1476_p0 }
   0xc   :  { %1486 = shalt.err (!%p1483_p4)
}
   0xd   :  { %s1577_s29 = smov 128   ;;  %s1578_s30 = smov 8  }
   0xe   :  { %39 = dma.hbm_to_vmem [thread:$0]  %s1844_s1, 6144, %s34_s25, [#allocation6], %s1577_s29, %s1577_s29, %s1578_s30  }
   0xf   :  { %s1495_s10 = scalar_lea.vmem %s22_s27, 384  ;;  %p1500_p6 = scmp.lt.s32.totalorder %s22_s27, %s22_s27 }
  0x10   :  { %p1496_p5 = scmp.ne.s32.totalorder %s22_s27, %s1495_s10  ;;  %p1501_p7 = scmp.lt.s32.totalorder %s1495_s10, %s1495_s10 }
  0x12   :  { %p1502_p8 = por %p1501_p7, %p1500_p6 }
  0x14   :  { %p1503_p9 = pnand %p1502_p8, %p1496_p5 }
  0x16   :  { %1506 = shalt.err (!%p1503_p9)
}
  0x17   :  { %27 = dma.hbm_to_vmem [thread:$0]  %s1843_s0, 384, %s22_s27, [#allocation3], %s1577_s29, %s1577_s29, %s1578_s30  }
  0x18   :  { %s1579_s13 = smov [#allocation7]   ;;  %s1580_s15 = smov [#allocation8]  }
  0x19   :  { %s47_s14 = sshll.u32 %s1579_s13, 4  ;;  %s61_s16 = sshll.u32 %s1580_s15, 4  ;;  %s48_s14 = int_to_ptr.vmem [resolvable:$true] %s47_s14  ;;  %s62_s16 = int_to_ptr.vmem [resolvable:$true] %s61_s16 }
  0x1a   :  { %s1515_s1 = scalar_lea.vmem %s48_s14, 6144  ;;  %p1520_p11 = scmp.lt.s32.totalorder %s48_s14, %s48_s14 }
  0x1b   :  { %p1516_p10 = scmp.ne.s32.totalorder %s48_s14, %s1515_s1  ;;  %p1521_p12 = scmp.lt.s32.totalorder %s1515_s1, %s1515_s1 }
  0x1d   :  { %p1522_p13 = por %p1521_p12, %p1520_p11 }
  0x1f   :  { %p1523_p0 = pnand %p1522_p13, %p1516_p10 }
  0x21   :  { %1526 = shalt.err (!%p1523_p0)
}
  0x22   :  { %53 = dma.hbm_to_vmem [thread:$0]  %s1846_s3, 6144, %s48_s14, [#allocation6], %s1577_s29, %s1577_s29, %s1578_s30  }
  0x23   :  { %s1535_s0 = scalar_lea.vmem %s62_s16, 6144  ;;  %p1540_p2 = scmp.lt.s32.totalorder %s62_s16, %s62_s16 }
  0x24   :  { %p1536_p1 = scmp.ne.s32.totalorder %s62_s16, %s1535_s0  ;;  %p1541_p3 = scmp.lt.s32.totalorder %s1535_s0, %s1535_s0 }
  0x26   :  { %p1542_p4 = por %p1541_p3, %p1540_p2 }
  0x28   :  { %p1543_p5 = pnand %p1542_p4, %p1536_p1 }
  0x2a   :  { %1546 = shalt.err (!%p1543_p5)
}
  0x2b   :  { %67 = dma.hbm_to_vmem [thread:$0]  %s1848_s5, 6144, %s62_s16, [#allocation9], %s1577_s29, %s1577_s29, %s1578_s30  }
  0x2c   :  { %1567 = dma.done.wait [#allocation3], 384  }
  0x2d   :  { %1568 = vsyncadd [#allocation3], 4294966912 }
  0x2e   :  { %1569 = dma.done.wait [#allocation6], 12288  }
  0x2f   :  { %1570 = vsyncadd [#allocation6], 4294955008 }
  0x30   :  { %1571 = dma.done.wait [#allocation9], 6144  }
  0x31   :  { %1572 = vsyncadd [#allocation9], 4294961152  ;;  %v1581_v0 = vmov 0.0   ;;  %vm1582_vm0 = vmmov 0   ;;  %v98_v1 = vld [vmem:[#allocation5 + $0x78] sm:$0xff]  ;;  %v97_v2 = vld [vmem:[#allocation5 + $0x70] sm:$0xff] }
  0x32   :  { %1137 = vmatprep.subr.mxu0 %v1581_v0  ;;  %1169 = vmatprep.mubr.msk.f32.mxu0 %vm1582_vm0, %v1581_v0  ;;  %v96_v3 = vld [vmem:[#allocation5 + $0x68] sm:$0xff]  ;;  %v95_v4 = vld [vmem:[#allocation5 + $0x60] sm:$0xff]  ;;  %v192_v5 = vld [vmem:[#allocation7 + $0x78] sm:$0xff]  ;;  %s1583_s15 = smov [#allocation10]  }
  0x33   :  { %1172 = vmatprep.subr.mxu1 %v1581_v0  ;;  %1204 = vmatprep.mubr.msk.f32.mxu1 %vm1582_vm0, %v1581_v0  ;;  %v94_v6 = vld [vmem:[#allocation5 + $0x58] sm:$0xff]  ;;  %v191_v7 = vld [vmem:[#allocation7 + $0x70] sm:$0xff]  ;;  %v190_v8 = vld [vmem:[#allocation7 + $0x68] sm:$0xff]  ;;  %s955_s16 = sshll.u32 %s1583_s15, 4  ;;  %s956_s16 = int_to_ptr.vmem [resolvable:$true] %s955_s16 }
  0x34   :  { %1138 = vmatpush3.msra.mxu0 %v98_v1  ;;  %1173 = vmatpush3.msra.mxu1 %v192_v5  ;;  %v93_v9 = vld [vmem:[#allocation5 + $0x50] sm:$0xff]  ;;  %v189_v10 = vld [vmem:[#allocation7 + $0x60] sm:$0xff]  ;;  %v92_v11 = vld [vmem:[#allocation5 + $0x48] sm:$0xff]  ;;  %s1547_s1 = scalar_lea.vmem %s956_s16, 384  ;;  %p1552_p7 = scmp.lt.s32.totalorder %s956_s16, %s956_s16 }
  0x35   :  { %1139 = vmatprep.subr.mxu0 %v1581_v0  ;;  %1174 = vmatprep.subr.mxu1 %v1581_v0  ;;  %v188_v12 = vld [vmem:[#allocation7 + $0x58] sm:$0xff]  ;;  %v91_v13 = vld [vmem:[#allocation5 + $0x40] sm:$0xff]  ;;  %v187_v14 = vld [vmem:[#allocation7 + $0x50] sm:$0xff]  ;;  %p1548_p6 = scmp.ne.s32.totalorder %s956_s16, %s1547_s1  ;;  %p1553_p8 = scmp.lt.s32.totalorder %s1547_s1, %s1547_s1 }
  0x36   :  { %1140 = vmatpush3.msra.mxu0 %v97_v2  ;;  %1175 = vmatpush3.msra.mxu1 %v191_v7  ;;  %v90_v15 = vld [vmem:[#allocation5 + $0x38] sm:$0xff]  ;;  %v186_v16 = vld [vmem:[#allocation7 + $0x48] sm:$0xff]  ;;  %v89_v17 = vld [vmem:[#allocation5 + $0x30] sm:$0xff] }
  0x37   :  { %1141 = vmatprep.subr.mxu0 %v1581_v0  ;;  %1176 = vmatprep.subr.mxu1 %v1581_v0  ;;  %v185_v18 = vld [vmem:[#allocation7 + $0x40] sm:$0xff]  ;;  %v88_v19 = vld [vmem:[#allocation5 + $0x28] sm:$0xff]  ;;  %v184_v20 = vld [vmem:[#allocation7 + $0x38] sm:$0xff]  ;;  %p1554_p9 = por %p1553_p8, %p1552_p7 }
  0x38   :  { %1142 = vmatpush3.msra.mxu0 %v96_v3  ;;  %1177 = vmatpush3.msra.mxu1 %v190_v8  ;;  %v87_v21 = vld [vmem:[#allocation5 + $0x20] sm:$0xff]  ;;  %v183_v22 = vld [vmem:[#allocation7 + $0x30] sm:$0xff]  ;;  %v86_v23 = vld [vmem:[#allocation5 + $0x18] sm:$0xff] }
  0x39   :  { %1143 = vmatprep.subr.mxu0 %v1581_v0  ;;  %1178 = vmatprep.subr.mxu1 %v1581_v0  ;;  %v182_v24 = vld [vmem:[#allocation7 + $0x28] sm:$0xff]  ;;  %v85_v25 = vld [vmem:[#allocation5 + $0x10] sm:$0xff]  ;;  %v181_v26 = vld [vmem:[#allocation7 + $0x20] sm:$0xff]  ;;  %p1555_p10 = pnand %p1554_p9, %p1548_p6 }
  0x3a   :  { %1144 = vmatpush3.msra.mxu0 %v95_v4  ;;  %1179 = vmatpush3.msra.mxu1 %v189_v10  ;;  %v84_v27 = vld [vmem:[#allocation5 + $0x8] sm:$0xff]  ;;  %v180_v28 = vld [vmem:[#allocation7 + $0x18] sm:$0xff]  ;;  %v83_v29 = vld [vmem:[#allocation5] sm:$0xff] }
  0x3b   :  { %1145 = vmatprep.subr.mxu0 %v1581_v0  ;;  %1180 = vmatprep.subr.mxu1 %v1581_v0  ;;  %v82_v30 = vld [vmem:[#allocation2] sm:$0xff]  ;;  %v179_v31 = vld [vmem:[#allocation7 + $0x10] sm:$0xff]  ;;  %v177_v33 = vld [vmem:[#allocation7] sm:$0xff] }
  0x3c   :  { %1146 = vmatpush3.msra.mxu0 %v94_v6  ;;  %1181 = vmatpush3.msra.mxu1 %v188_v12  ;;  %v178_v32 = vld [vmem:[#allocation7 + $0x8] sm:$0xff]  ;;  %v286_v34 = vld [vmem:[#allocation8 + $0x78] sm:$0xff]  ;;  %v285_v35 = vld [vmem:[#allocation8 + $0x70] sm:$0xff] }
  0x3d   :  { %1147 = vmatprep.subr.mxu0 %v1581_v0  ;;  %1182 = vmatprep.subr.mxu1 %v1581_v0  ;;  %v284_v36 = vld [vmem:[#allocation8 + $0x68] sm:$0xff]  ;;  %v283_v37 = vld [vmem:[#allocation8 + $0x60] sm:$0xff]  ;;  %v282_v38 = vld [vmem:[#allocation8 + $0x58] sm:$0xff] }
  0x3e   :  { %1148 = vmatpush3.msra.mxu0 %v93_v9  ;;  %1183 = vmatpush3.msra.mxu1 %v187_v14  ;;  %v281_v39 = vld [vmem:[#allocation8 + $0x50] sm:$0xff]  ;;  %v280_v40 = vld [vmem:[#allocation8 + $0x48] sm:$0xff]  ;;  %v279_v41 = vld [vmem:[#allocation8 + $0x40] sm:$0xff] }
  0x3f   :  { %1149 = vmatprep.subr.mxu0 %v1581_v0  ;;  %1184 = vmatprep.subr.mxu1 %v1581_v0  ;;  %v278_v42 = vld [vmem:[#allocation8 + $0x38] sm:$0xff]  ;;  %v277_v43 = vld [vmem:[#allocation8 + $0x30] sm:$0xff]  ;;  %v276_v44 = vld [vmem:[#allocation8 + $0x28] sm:$0xff] }
  0x40   :  { %1150 = vmatpush3.msra.mxu0 %v92_v11  ;;  %1185 = vmatpush3.msra.mxu1 %v186_v16  ;;  %v275_v45 = vld [vmem:[#allocation8 + $0x20] sm:$0xff]  ;;  %v274_v46 = vld [vmem:[#allocation8 + $0x18] sm:$0xff]  ;;  %v273_v47 = vld [vmem:[#allocation8 + $0x10] sm:$0xff] }
  0x41   :  { %1151 = vmatprep.subr.mxu0 %v1581_v0  ;;  %1186 = vmatprep.subr.mxu1 %v1581_v0  ;;  %v969_v48 = vld [vmem:[%s1845_s2] ss:$0 sm:$0xff]  ;;  %v384_v53 = vld [vmem:[#allocation5 + $0xf8] sm:$0xff]  ;;  %v383_v54 = vld [vmem:[#allocation5 + $0xf0] sm:$0xff] }
  0x42   :  { %1152 = vmatpush3.msra.mxu0 %v91_v13  ;;  %1187 = vmatpush3.msra.mxu1 %v185_v18  ;;  %v382_v55 = vld [vmem:[#allocation5 + $0xe8] sm:$0xff]  ;;  %v381_v56 = vld [vmem:[#allocation5 + $0xe0] sm:$0xff]  ;;  %v380_v57 = vld [vmem:[#allocation5 + $0xd8] sm:$0xff] }
  0x43   :  { %1153 = vmatprep.subr.mxu0 %v1581_v0  ;;  %1188 = vmatprep.subr.mxu1 %v1581_v0  ;;  %v379_v58 = vld [vmem:[#allocation5 + $0xd0] sm:$0xff]  ;;  %v378_v59 = vld [vmem:[#allocation5 + $0xc8] sm:$0xff]  ;;  %v377_v60 = vld [vmem:[#allocation5 + $0xc0] sm:$0xff] }
  0x44   :  { %1154 = vmatpush3.msra.mxu0 %v90_v15  ;;  %1189 = vmatpush3.msra.mxu1 %v184_v20  ;;  %v376_v61 = vld [vmem:[#allocation5 + $0xb8] sm:$0xff]  ;;  %v375_v62 = vld [vmem:[#allocation5 + $0xb0] sm:$0xff]  ;;  %v374_v63 = vld [vmem:[#allocation5 + $0xa8] sm:$0xff] }
  0x45   :  { %1155 = vmatprep.subr.mxu0 %v1581_v0  ;;  %1190 = vmatprep.subr.mxu1 %v1581_v0  ;;  %v373_v1 = vld [vmem:[#allocation5 + $0xa0] sm:$0xff]  ;;  %v372_v2 = vld [vmem:[#allocation5 + $0x98] sm:$0xff]  ;;  %v371_v3 = vld [vmem:[#allocation5 + $0x90] sm:$0xff] }
  0x46   :  { %1156 = vmatpush3.msra.mxu0 %v89_v17  ;;  %1191 = vmatpush3.msra.mxu1 %v183_v22  ;;  %v370_v4 = vld [vmem:[#allocation5 + $0x88] sm:$0xff]  ;;  %v369_v5 = vld [vmem:[#allocation5 + $0x80] sm:$0xff]  ;;  %v367_v6 = vld [vmem:[#allocation2 + $0x8] sm:$0xff] }
  0x47   :  { %1157 = vmatprep.subr.mxu0 %v1581_v0  ;;  %1192 = vmatprep.subr.mxu1 %v1581_v0  ;;  %v272_v7 = vld [vmem:[#allocation8 + $0x8] sm:$0xff]  ;;  %v271_v8 = vld [vmem:[#allocation8] sm:$0xff]  ;;  %v480_v14 = vld [vmem:[#allocation7 + $0xf8] sm:$0xff] }
  0x48   :  { %1158 = vmatpush3.msra.mxu0 %v88_v19  ;;  %1193 = vmatpush3.msra.mxu1 %v182_v24  ;;  %v970_v9 = vld [vmem:[%s1847_s4] ss:$0 sm:$0xff]  ;;  %v479_v15 = vld [vmem:[#allocation7 + $0xf0] sm:$0xff]  ;;  %v477_v17 = vld [vmem:[#allocation7 + $0xe0] sm:$0xff] }
  0x49   :  { %1159 = vmatprep.subr.mxu0 %v1581_v0  ;;  %1194 = vmatprep.subr.mxu1 %v1581_v0  ;;  %v478_v16 = vld [vmem:[#allocation7 + $0xe8] sm:$0xff]  ;;  %v476_v18 = vld [vmem:[#allocation7 + $0xd8] sm:$0xff]  ;;  %v475_v19 = vld [vmem:[#allocation7 + $0xd0] sm:$0xff] }
  0x4a   :  { %1160 = vmatpush3.msra.mxu0 %v87_v21  ;;  %1195 = vmatpush3.msra.mxu1 %v181_v26  ;;  %v474_v20 = vld [vmem:[#allocation7 + $0xc8] sm:$0xff]  ;;  %v473_v21 = vld [vmem:[#allocation7 + $0xc0] sm:$0xff]  ;;  %v472_v22 = vld [vmem:[#allocation7 + $0xb8] sm:$0xff] }
  0x4b   :  { %1161 = vmatprep.subr.mxu0 %v1581_v0  ;;  %1196 = vmatprep.subr.mxu1 %v1581_v0  ;;  %v470_v24 = vld [vmem:[#allocation7 + $0xa8] sm:$0xff]  ;;  %v468_v26 = vld [vmem:[#allocation7 + $0x98] sm:$0xff] }
  0x4c   :  { %1162 = vmatpush3.msra.mxu0 %v86_v23  ;;  %1197 = vmatpush3.msra.mxu1 %v180_v28  ;;  %v471_v23 = vld [vmem:[#allocation7 + $0xb0] sm:$0xff]  ;;  %v973_v28 = vld [vmem:[%s1845_s2 + $0x1] ss:$0 sm:$0xff] }
  0x4d   :  { %1163 = vmatprep.subr.mxu0 %v1581_v0  ;;  %1198 = vmatprep.subr.mxu1 %v1581_v0 }
  0x4e   :  { %1164 = vmatpush3.msra.mxu0 %v85_v25  ;;  %1199 = vmatpush3.msra.mxu1 %v179_v31  ;;  %v469_v25 = vld [vmem:[#allocation7 + $0xa0] sm:$0xff] }
  0x4f   :  { %1165 = vmatprep.subr.mxu0 %v1581_v0  ;;  %1200 = vmatprep.subr.mxu1 %v1581_v0 }
  0x50   :  { %1166 = vmatpush3.msra.mxu0 %v84_v27  ;;  %1201 = vmatpush3.msra.mxu1 %v178_v32  ;;  %v467_v27 = vld [vmem:[#allocation7 + $0x90] sm:$0xff]  ;;  %v465_v32 = vld [vmem:[#allocation7 + $0x80] sm:$0xff] }
  0x51   :  { %1167 = vmatprep.subr.mxu0 %v1581_v0  ;;  %1202 = vmatprep.subr.mxu1 %v1581_v0 }
  0x52   :  { %1168 = vmatpush3.msra.mxu0 %v83_v29  ;;  %1203 = vmatpush3.msra.mxu1 %v177_v33  ;;  %v466_v29 = vld [vmem:[#allocation7 + $0x88] sm:$0xff] }
  0x53   :  { %1170 = vmatmul.mubr.f32.vlgmr.msra.gmra.mxu0 %v82_v30  ;;  %1207 = vmatprep.subr.mxu0 %v1581_v0 }
  0x54   :  { %1239 = vmatprep.mubr.msk.f32.mxu0 %vm1582_vm0, %v1581_v0  ;;  %1242 = vmatprep.subr.mxu1 %v1581_v0 }
  0x55   :  { %1208 = vmatpush3.msra.mxu0 %v286_v34 }
  0x56   :  { %1209 = vmatprep.subr.mxu0 %v1581_v0 }
  0x57   :  { %1210 = vmatpush3.msra.mxu0 %v285_v35  ;;  %v676_v35 = vld [vmem:[#allocation5 + $0x178] sm:$0xff] }
  0x58   :  { %1211 = vmatprep.subr.mxu0 %v1581_v0 }
  0x59   :  { %1212 = vmatpush3.msra.mxu0 %v284_v36  ;;  %v675_v36 = vld [vmem:[#allocation5 + $0x170] sm:$0xff] }
  0x5a   :  { %1213 = vmatprep.subr.mxu0 %v1581_v0 }
  0x5b   :  { %1214 = vmatpush3.msra.mxu0 %v283_v37  ;;  %v674_v37 = vld [vmem:[#allocation5 + $0x168] sm:$0xff] }
  0x5c   :  { %1215 = vmatprep.subr.mxu0 %v1581_v0 }
  0x5d   :  { %1216 = vmatpush3.msra.mxu0 %v282_v38  ;;  %v673_v38 = vld [vmem:[#allocation5 + $0x160] sm:$0xff] }
  0x5e   :  { %1217 = vmatprep.subr.mxu0 %v1581_v0 }
  0x5f   :  { %1218 = vmatpush3.msra.mxu0 %v281_v39  ;;  %v672_v39 = vld [vmem:[#allocation5 + $0x158] sm:$0xff] }
  0x60   :  { %1219 = vmatprep.subr.mxu0 %v1581_v0 }
  0x61   :  { %1220 = vmatpush3.msra.mxu0 %v280_v40  ;;  %v671_v40 = vld [vmem:[#allocation5 + $0x150] sm:$0xff] }
  0x62   :  { %1221 = vmatprep.subr.mxu0 %v1581_v0 }
  0x63   :  { %1222 = vmatpush3.msra.mxu0 %v279_v41  ;;  %v670_v41 = vld [vmem:[#allocation5 + $0x148] sm:$0xff] }
  0x64   :  { %1223 = vmatprep.subr.mxu0 %v1581_v0 }
  0x65   :  { %1224 = vmatpush3.msra.mxu0 %v278_v42  ;;  %v669_v42 = vld [vmem:[#allocation5 + $0x140] sm:$0xff] }
  0x66   :  { %1225 = vmatprep.subr.mxu0 %v1581_v0 }
  0x67   :  { %1226 = vmatpush3.msra.mxu0 %v277_v43  ;;  %v668_v43 = vld [vmem:[#allocation5 + $0x138] sm:$0xff] }
  0x68   :  { %1227 = vmatprep.subr.mxu0 %v1581_v0 }
  0x69   :  { %1228 = vmatpush3.msra.mxu0 %v276_v44  ;;  %v667_v44 = vld [vmem:[#allocation5 + $0x130] sm:$0xff] }
  0x6a   :  { %1229 = vmatprep.subr.mxu0 %v1581_v0 }
  0x6b   :  { %1230 = vmatpush3.msra.mxu0 %v275_v45  ;;  %v666_v45 = vld [vmem:[#allocation5 + $0x128] sm:$0xff] }
  0x6c   :  { %1231 = vmatprep.subr.mxu0 %v1581_v0 }
  0x6d   :  { %1232 = vmatpush3.msra.mxu0 %v274_v46  ;;  %v665_v46 = vld [vmem:[#allocation5 + $0x120] sm:$0xff] }
  0x6e   :  { %1233 = vmatprep.subr.mxu0 %v1581_v0 }
  0x6f   :  { %1234 = vmatpush3.msra.mxu0 %v273_v47  ;;  %v664_v47 = vld [vmem:[#allocation5 + $0x118] sm:$0xff] }
  0x70   :  { %1235 = vmatprep.subr.mxu0 %v1581_v0 }
  0x71   :  { %1236 = vmatpush3.msra.mxu0 %v272_v7 }
  0x72   :  { %1237 = vmatprep.subr.mxu0 %v1581_v0 }
  0x73   :  { %1238 = vmatpush3.msra.mxu0 %v271_v8 }
  0x74   :  { %1277 = vmatprep.subr.mxu0 %v1581_v0 }
 0x113   :  { %v172_v49 = vpop.f32.mrf.mxu0 }
 0x114   :  { %v173_v50 = vadd.f32 %v969_v48, %v172_v49  ;;  %v663_v48 = vld [vmem:[#allocation5 + $0x110] sm:$0xff]  ;;  %v662_v49 = vld [vmem:[#allocation5 + $0x108] sm:$0xff] }
 0x115   :  { %v1171_v51 = vpop.f32.mrf.mxu0 }
 0x116   :  { %v176_v52 = vmax.f32 %v173_v50, 0.0  ;;  %v661_v50 = vld [vmem:[#allocation5 + $0x100] sm:$0xff]  ;;  %v659_v51 = vld [vmem:[#allocation2 + $0x10] sm:$0xff] }
 0x118   :  { %1205 = vmatmul.mubr.f32.vlgmr.msra.gmra.mxu1 %v176_v52  ;;  %v576_v52 = vld [vmem:[#allocation8 + $0xf8] sm:$0xff] }
 0x119   :  { %1243 = vmatpush3.msra.mxu1 %v384_v53  ;;  %1274 = vmatprep.mubr.msk.f32.mxu1 %vm1582_vm0, %v1581_v0  ;;  %v575_v53 = vld [vmem:[#allocation8 + $0xf0] sm:$0xff] }
 0x11a   :  { %1244 = vmatprep.subr.mxu1 %v1581_v0 }
 0x11b   :  { %1245 = vmatpush3.msra.mxu1 %v383_v54  ;;  %v574_v54 = vld [vmem:[#allocation8 + $0xe8] sm:$0xff] }
 0x11c   :  { %1246 = vmatprep.subr.mxu1 %v1581_v0 }
 0x11d   :  { %1247 = vmatpush3.msra.mxu1 %v382_v55  ;;  %v573_v55 = vld [vmem:[#allocation8 + $0xe0] sm:$0xff] }
 0x11e   :  { %1248 = vmatprep.subr.mxu1 %v1581_v0 }
 0x11f   :  { %1249 = vmatpush3.msra.mxu1 %v381_v56  ;;  %v572_v56 = vld [vmem:[#allocation8 + $0xd8] sm:$0xff] }
 0x120   :  { %1250 = vmatprep.subr.mxu1 %v1581_v0 }
 0x121   :  { %1251 = vmatpush3.msra.mxu1 %v380_v57  ;;  %v571_v57 = vld [vmem:[#allocation8 + $0xd0] sm:$0xff] }
 0x122   :  { %1252 = vmatprep.subr.mxu1 %v1581_v0 }
 0x123   :  { %1253 = vmatpush3.msra.mxu1 %v379_v58  ;;  %v570_v58 = vld [vmem:[#allocation8 + $0xc8] sm:$0xff] }
 0x124   :  { %1254 = vmatprep.subr.mxu1 %v1581_v0 }
 0x125   :  { %1255 = vmatpush3.msra.mxu1 %v378_v59  ;;  %v569_v59 = vld [vmem:[#allocation8 + $0xc0] sm:$0xff] }
 0x126   :  { %1256 = vmatprep.subr.mxu1 %v1581_v0 }
 0x127   :  { %1257 = vmatpush3.msra.mxu1 %v377_v60  ;;  %v568_v60 = vld [vmem:[#allocation8 + $0xb8] sm:$0xff] }
 0x128   :  { %1258 = vmatprep.subr.mxu1 %v1581_v0 }
 0x129   :  { %1259 = vmatpush3.msra.mxu1 %v376_v61  ;;  %v567_v61 = vld [vmem:[#allocation8 + $0xb0] sm:$0xff] }
 0x12a   :  { %1260 = vmatprep.subr.mxu1 %v1581_v0 }
 0x12b   :  { %1261 = vmatpush3.msra.mxu1 %v375_v62  ;;  %v566_v62 = vld [vmem:[#allocation8 + $0xa8] sm:$0xff] }
 0x12c   :  { %1262 = vmatprep.subr.mxu1 %v1581_v0 }
 0x12d   :  { %1263 = vmatpush3.msra.mxu1 %v374_v63  ;;  %v565_v63 = vld [vmem:[#allocation8 + $0xa0] sm:$0xff] }
 0x12e   :  { %1264 = vmatprep.subr.mxu1 %v1581_v0 }
 0x12f   :  { %1265 = vmatpush3.msra.mxu1 %v373_v1  ;;  %v564_v1 = vld [vmem:[#allocation8 + $0x98] sm:$0xff] }
 0x130   :  { %1266 = vmatprep.subr.mxu1 %v1581_v0 }
 0x131   :  { %1267 = vmatpush3.msra.mxu1 %v372_v2  ;;  %v563_v2 = vld [vmem:[#allocation8 + $0x90] sm:$0xff] }
 0x132   :  { %1268 = vmatprep.subr.mxu1 %v1581_v0 }
 0x133   :  { %1269 = vmatpush3.msra.mxu1 %v371_v3  ;;  %v562_v3 = vld [vmem:[#allocation8 + $0x88] sm:$0xff] }
 0x134   :  { %1270 = vmatprep.subr.mxu1 %v1581_v0 }
 0x135   :  { %1271 = vmatpush3.msra.mxu1 %v370_v4  ;;  %v561_v4 = vld [vmem:[#allocation8 + $0x80] sm:$0xff] }
 0x136   :  { %1272 = vmatprep.subr.mxu1 %v1581_v0 }
 0x137   :  { %1273 = vmatpush3.msra.mxu1 %v369_v5  ;;  %v971_v5 = vld [vmem:[%s1849_s6] ss:$0 sm:$0xff] }
 0x138   :  { %1275 = vmatmul.mubr.f32.vlgmr.msra.gmra.mxu1 %v367_v6  ;;  %1312 = vmatprep.subr.mxu1 %v1581_v0 }
 0x139   :  { %1344 = vmatprep.mubr.msk.f32.mxu1 %vm1582_vm0, %v1581_v0  ;;  %1313 = vmatpush3.msra.mxu1 %v576_v52  ;;  %v977_v52 = vld [vmem:[%s1849_s6 + $0x1] ss:$0 sm:$0xff] }
 0x13a   :  { %1314 = vmatprep.subr.mxu1 %v1581_v0 }
 0x13b   :  { %1315 = vmatpush3.msra.mxu1 %v575_v53 }
 0x13c   :  { %1316 = vmatprep.subr.mxu1 %v1581_v0 }
 0x13d   :  { %1317 = vmatpush3.msra.mxu1 %v574_v54 }
 0x13e   :  { %1318 = vmatprep.subr.mxu1 %v1581_v0 }
 0x13f   :  { %1319 = vmatpush3.msra.mxu1 %v573_v55 }
 0x140   :  { %1320 = vmatprep.subr.mxu1 %v1581_v0 }
 0x141   :  { %1321 = vmatpush3.msra.mxu1 %v572_v56 }
 0x142   :  { %1322 = vmatprep.subr.mxu1 %v1581_v0 }
 0x143   :  { %1323 = vmatpush3.msra.mxu1 %v571_v57  ;;  %v981_v57 = vld [vmem:[%s1847_s4 + $0x2] ss:$0 sm:$0xff] }
 0x144   :  { %1324 = vmatprep.subr.mxu1 %v1581_v0 }
 0x145   :  { %1325 = vmatpush3.msra.mxu1 %v570_v58 }
 0x146   :  { %1326 = vmatprep.subr.mxu1 %v1581_v0 }
 0x147   :  { %1327 = vmatpush3.msra.mxu1 %v569_v59 }
 0x148   :  { %1328 = vmatprep.subr.mxu1 %v1581_v0 }
 0x149   :  { %1329 = vmatpush3.msra.mxu1 %v568_v60 }
 0x14a   :  { %1330 = vmatprep.subr.mxu1 %v1581_v0 }
 0x14b   :  { %1331 = vmatpush3.msra.mxu1 %v567_v61  ;;  %v983_v61 = vld [vmem:[%s1849_s6 + $0x2] ss:$0 sm:$0xff] }
 0x14c   :  { %1332 = vmatprep.subr.mxu1 %v1581_v0 }
 0x14d   :  { %1333 = vmatpush3.msra.mxu1 %v566_v62 }
 0x14e   :  { %1334 = vmatprep.subr.mxu1 %v1581_v0 }
 0x14f   :  { %1335 = vmatpush3.msra.mxu1 %v565_v63 }
 0x150   :  { %1336 = vmatprep.subr.mxu1 %v1581_v0 }
 0x151   :  { %1337 = vmatpush3.msra.mxu1 %v564_v1 }
 0x152   :  { %1338 = vmatprep.subr.mxu1 %v1581_v0 }
 0x153   :  { %1339 = vmatpush3.msra.mxu1 %v563_v2 }
 0x154   :  { %1340 = vmatprep.subr.mxu1 %v1581_v0 }
 0x155   :  { %1341 = vmatpush3.msra.mxu1 %v562_v3 }
 0x156   :  { %1342 = vmatprep.subr.mxu1 %v1581_v0 }
 0x157   :  { %1343 = vmatpush3.msra.mxu1 %v561_v4 }
 0x158   :  { %1382 = vmatprep.subr.mxu1 %v1581_v0 }
 0x1d8   :  { %v266_v10 = vpop.f32.mrf.mxu1 }
 0x1d9   :  { %v267_v11 = vadd.f32 %v970_v9, %v266_v10  ;;  %v975_v10 = vld [vmem:[%s1847_s4 + $0x1] ss:$0 sm:$0xff] }
 0x1da   :  { %v1206_v12 = vpop.f32.mrf.mxu1 }
 0x1db   :  { %v270_v13 = vmax.f32 %v267_v11, 0.0 }
 0x1dd   :  { %1240 = vmatmul.mubr.f32.vlgmr.msra.gmra.mxu0 %v270_v13 }
 0x1de   :  { %1278 = vmatpush3.msra.mxu0 %v480_v14  ;;  %1309 = vmatprep.mubr.msk.f32.mxu0 %vm1582_vm0, %v1581_v0 }
 0x1df   :  { %1279 = vmatprep.subr.mxu0 %v1581_v0 }
 0x1e0   :  { %1280 = vmatpush3.msra.mxu0 %v479_v15  ;;  %v772_v15 = vld [vmem:[#allocation7 + $0x178] sm:$0xff] }
 0x1e1   :  { %1281 = vmatprep.subr.mxu0 %v1581_v0 }
 0x1e2   :  { %1282 = vmatpush3.msra.mxu0 %v478_v16  ;;  %v771_v16 = vld [vmem:[#allocation7 + $0x170] sm:$0xff] }
 0x1e3   :  { %1283 = vmatprep.subr.mxu0 %v1581_v0 }
 0x1e4   :  { %1284 = vmatpush3.msra.mxu0 %v477_v17  ;;  %v770_v17 = vld [vmem:[#allocation7 + $0x168] sm:$0xff] }
 0x1e5   :  { %1285 = vmatprep.subr.mxu0 %v1581_v0 }
 0x1e6   :  { %1286 = vmatpush3.msra.mxu0 %v476_v18  ;;  %v769_v18 = vld [vmem:[#allocation7 + $0x160] sm:$0xff] }
 0x1e7   :  { %1287 = vmatprep.subr.mxu0 %v1581_v0 }
 0x1e8   :  { %1288 = vmatpush3.msra.mxu0 %v475_v19  ;;  %v768_v19 = vld [vmem:[#allocation7 + $0x158] sm:$0xff] }
 0x1e9   :  { %1289 = vmatprep.subr.mxu0 %v1581_v0 }
 0x1ea   :  { %1290 = vmatpush3.msra.mxu0 %v474_v20  ;;  %v767_v20 = vld [vmem:[#allocation7 + $0x150] sm:$0xff] }
 0x1eb   :  { %1291 = vmatprep.subr.mxu0 %v1581_v0 }
 0x1ec   :  { %1292 = vmatpush3.msra.mxu0 %v473_v21  ;;  %v766_v21 = vld [vmem:[#allocation7 + $0x148] sm:$0xff] }
 0x1ed   :  { %1293 = vmatprep.subr.mxu0 %v1581_v0 }
 0x1ee   :  { %1294 = vmatpush3.msra.mxu0 %v472_v22  ;;  %v765_v22 = vld [vmem:[#allocation7 + $0x140] sm:$0xff] }
 0x1ef   :  { %1295 = vmatprep.subr.mxu0 %v1581_v0 }
 0x1f0   :  { %1296 = vmatpush3.msra.mxu0 %v471_v23  ;;  %v764_v23 = vld [vmem:[#allocation7 + $0x138] sm:$0xff] }
 0x1f1   :  { %1297 = vmatprep.subr.mxu0 %v1581_v0 }
 0x1f2   :  { %1298 = vmatpush3.msra.mxu0 %v470_v24  ;;  %v763_v24 = vld [vmem:[#allocation7 + $0x130] sm:$0xff] }
 0x1f3   :  { %1299 = vmatprep.subr.mxu0 %v1581_v0 }
 0x1f4   :  { %1300 = vmatpush3.msra.mxu0 %v469_v25  ;;  %v762_v25 = vld [vmem:[#allocation7 + $0x128] sm:$0xff] }
 0x1f5   :  { %1301 = vmatprep.subr.mxu0 %v1581_v0 }
 0x1f6   :  { %1302 = vmatpush3.msra.mxu0 %v468_v26  ;;  %v761_v26 = vld [vmem:[#allocation7 + $0x120] sm:$0xff] }
 0x1f7   :  { %1303 = vmatprep.subr.mxu0 %v1581_v0 }
 0x1f8   :  { %v459_v30 = vpop.f32.mrf.mxu1  ;;  %1304 = vmatpush3.msra.mxu0 %v467_v27  ;;  %v760_v27 = vld [vmem:[#allocation7 + $0x118] sm:$0xff] }
 0x1f9   :  { %v460_v31 = vadd.f32 %v973_v28, %v459_v30  ;;  %1305 = vmatprep.subr.mxu0 %v1581_v0  ;;  %v759_v28 = vld [vmem:[#allocation7 + $0x110] sm:$0xff]  ;;  %v758_v30 = vld [vmem:[#allocation7 + $0x108] sm:$0xff] }
 0x1fa   :  { %v1276_v33 = vpop.f32.mrf.mxu1  ;;  %1306 = vmatpush3.msra.mxu0 %v466_v29  ;;  %v979_v29 = vld [vmem:[%s1845_s2 + $0x2] ss:$0 sm:$0xff] }
 0x1fb   :  { %v463_v34 = vmax.f32 %v460_v31, 0.0  ;;  %1307 = vmatprep.subr.mxu0 %v1581_v0  ;;  %v757_v33 = vld [vmem:[#allocation7 + $0x100] sm:$0xff] }
 0x1fc   :  { %1308 = vmatpush3.msra.mxu0 %v465_v32 }
 0x1fd   :  { %1310 = vmatmul.mubr.f32.vlgmr.msra.gmra.mxu0 %v463_v34  ;;  %1347 = vmatprep.subr.mxu0 %v1581_v0 }
 0x1fe   :  { %1348 = vmatpush3.msra.mxu0 %v676_v35  ;;  %1379 = vmatprep.mubr.msk.f32.mxu0 %vm1582_vm0, %v1581_v0 }
 0x1ff   :  { %1349 = vmatprep.subr.mxu0 %v1581_v0 }
 0x200   :  { %1350 = vmatpush3.msra.mxu0 %v675_v36  ;;  %v868_v36 = vld [vmem:[#allocation8 + $0x178] sm:$0xff] }
 0x201   :  { %1351 = vmatprep.subr.mxu0 %v1581_v0 }
 0x202   :  { %1352 = vmatpush3.msra.mxu0 %v674_v37  ;;  %v867_v37 = vld [vmem:[#allocation8 + $0x170] sm:$0xff] }
 0x203   :  { %1353 = vmatprep.subr.mxu0 %v1581_v0 }
 0x204   :  { %1354 = vmatpush3.msra.mxu0 %v673_v38  ;;  %v866_v38 = vld [vmem:[#allocation8 + $0x168] sm:$0xff] }
 0x205   :  { %1355 = vmatprep.subr.mxu0 %v1581_v0 }
 0x206   :  { %1356 = vmatpush3.msra.mxu0 %v672_v39  ;;  %v865_v39 = vld [vmem:[#allocation8 + $0x160] sm:$0xff] }
 0x207   :  { %1357 = vmatprep.subr.mxu0 %v1581_v0 }
 0x208   :  { %1358 = vmatpush3.msra.mxu0 %v671_v40  ;;  %v864_v40 = vld [vmem:[#allocation8 + $0x158] sm:$0xff] }
 0x209   :  { %1359 = vmatprep.subr.mxu0 %v1581_v0 }
 0x20a   :  { %1360 = vmatpush3.msra.mxu0 %v670_v41  ;;  %v863_v41 = vld [vmem:[#allocation8 + $0x150] sm:$0xff] }
 0x20b   :  { %1361 = vmatprep.subr.mxu0 %v1581_v0 }
 0x20c   :  { %1362 = vmatpush3.msra.mxu0 %v669_v42  ;;  %v862_v42 = vld [vmem:[#allocation8 + $0x148] sm:$0xff] }
 0x20d   :  { %1363 = vmatprep.subr.mxu0 %v1581_v0 }
 0x20e   :  { %1364 = vmatpush3.msra.mxu0 %v668_v43  ;;  %v861_v43 = vld [vmem:[#allocation8 + $0x140] sm:$0xff] }
 0x20f   :  { %1365 = vmatprep.subr.mxu0 %v1581_v0 }
 0x210   :  { %1366 = vmatpush3.msra.mxu0 %v667_v44  ;;  %v860_v44 = vld [vmem:[#allocation8 + $0x138] sm:$0xff] }
 0x211   :  { %1367 = vmatprep.subr.mxu0 %v1581_v0 }
 0x212   :  { %1368 = vmatpush3.msra.mxu0 %v666_v45  ;;  %v859_v45 = vld [vmem:[#allocation8 + $0x130] sm:$0xff] }
 0x213   :  { %1369 = vmatprep.subr.mxu0 %v1581_v0 }
 0x214   :  { %1370 = vmatpush3.msra.mxu0 %v665_v46  ;;  %v858_v46 = vld [vmem:[#allocation8 + $0x128] sm:$0xff] }
 0x215   :  { %1371 = vmatprep.subr.mxu0 %v1581_v0 }
 0x216   :  { %1372 = vmatpush3.msra.mxu0 %v664_v47  ;;  %v857_v47 = vld [vmem:[#allocation8 + $0x120] sm:$0xff] }
 0x217   :  { %1373 = vmatprep.subr.mxu0 %v1581_v0 }
 0x218   :  { %1374 = vmatpush3.msra.mxu0 %v663_v48  ;;  %v856_v48 = vld [vmem:[#allocation8 + $0x118] sm:$0xff] }
 0x219   :  { %1375 = vmatprep.subr.mxu0 %v1581_v0 }
 0x21a   :  { %1376 = vmatpush3.msra.mxu0 %v662_v49  ;;  %v855_v49 = vld [vmem:[#allocation8 + $0x110] sm:$0xff] }
 0x21b   :  { %1377 = vmatprep.subr.mxu0 %v1581_v0 }
 0x21c   :  { %1378 = vmatpush3.msra.mxu0 %v661_v50  ;;  %v854_v50 = vld [vmem:[#allocation8 + $0x108] sm:$0xff] }
 0x21d   :  { %1380 = vmatmul.mubr.f32.vlgmr.msra.gmra.mxu0 %v659_v51  ;;  %1417 = vmatprep.subr.mxu0 %v1581_v0  ;;  %v853_v51 = vld [vmem:[#allocation8 + $0x100] sm:$0xff] }
 0x21e   :  { %1449 = vmatprep.mubr.msk.f32.mxu0 %vm1582_vm0, %v1581_v0  ;;  %1418 = vmatpush3.msra.mxu0 %v868_v36 }
 0x21f   :  { %1419 = vmatprep.subr.mxu0 %v1581_v0 }
 0x220   :  { %1420 = vmatpush3.msra.mxu0 %v867_v37 }
 0x221   :  { %1421 = vmatprep.subr.mxu0 %v1581_v0 }
 0x222   :  { %1422 = vmatpush3.msra.mxu0 %v866_v38 }
 0x223   :  { %1423 = vmatprep.subr.mxu0 %v1581_v0 }
 0x224   :  { %1424 = vmatpush3.msra.mxu0 %v865_v39 }
 0x225   :  { %1425 = vmatprep.subr.mxu0 %v1581_v0 }
 0x226   :  { %1426 = vmatpush3.msra.mxu0 %v864_v40 }
 0x227   :  { %1427 = vmatprep.subr.mxu0 %v1581_v0 }
 0x228   :  { %1428 = vmatpush3.msra.mxu0 %v863_v41 }
 0x229   :  { %1429 = vmatprep.subr.mxu0 %v1581_v0 }
 0x22a   :  { %1430 = vmatpush3.msra.mxu0 %v862_v42 }
 0x22b   :  { %1431 = vmatprep.subr.mxu0 %v1581_v0 }
 0x22c   :  { %1432 = vmatpush3.msra.mxu0 %v861_v43 }
 0x22d   :  { %1433 = vmatprep.subr.mxu0 %v1581_v0 }
 0x22e   :  { %1434 = vmatpush3.msra.mxu0 %v860_v44 }
 0x22f   :  { %1435 = vmatprep.subr.mxu0 %v1581_v0 }
 0x230   :  { %1436 = vmatpush3.msra.mxu0 %v859_v45 }
 0x231   :  { %1437 = vmatprep.subr.mxu0 %v1581_v0 }
 0x232   :  { %1438 = vmatpush3.msra.mxu0 %v858_v46 }
 0x233   :  { %1439 = vmatprep.subr.mxu0 %v1581_v0 }
 0x234   :  { %1440 = vmatpush3.msra.mxu0 %v857_v47 }
 0x235   :  { %1441 = vmatprep.subr.mxu0 %v1581_v0 }
 0x236   :  { %1442 = vmatpush3.msra.mxu0 %v856_v48 }
 0x237   :  { %1443 = vmatprep.subr.mxu0 %v1581_v0 }
 0x238   :  { %1444 = vmatpush3.msra.mxu0 %v855_v49 }
 0x239   :  { %1445 = vmatprep.subr.mxu0 %v1581_v0 }
 0x23a   :  { %1446 = vmatpush3.msra.mxu0 %v854_v50 }
 0x23b   :  { %1447 = vmatprep.subr.mxu0 %v1581_v0 }
 0x23c   :  { %1448 = vmatpush3.msra.mxu0 %v853_v51 }
 0x29d   :  { %v360_v6 = vpop.f32.mrf.mxu0 }
 0x29e   :  { %v361_v7 = vadd.f32 %v971_v5, %v360_v6 }
 0x29f   :  { %v1241_v8 = vpop.f32.mrf.mxu0 }
 0x2a0   :  { %1461 = vtanh.f32 %v361_v7 }
 0x2ad   :  { %v1462_v9 = vpop.eup %1461 }
 0x2ae   :  { %365 = vst [vmem:[#allocation10] sm:$0xff] %v1462_v9 }
 0x2bd   :  { %v555_v11 = vpop.f32.mrf.mxu0 }
 0x2be   :  { %v556_v12 = vadd.f32 %v975_v10, %v555_v11 }
 0x2bf   :  { %v1311_v13 = vpop.f32.mrf.mxu0 }
 0x2c0   :  { %v559_v14 = vmax.f32 %v556_v12, 0.0 }
 0x2c2   :  { %1345 = vmatmul.mubr.f32.vlgmr.msra.gmra.mxu1 %v559_v14 }
 0x2c3   :  { %1383 = vmatpush3.msra.mxu1 %v772_v15  ;;  %1414 = vmatprep.mubr.msk.f32.mxu1 %vm1582_vm0, %v1581_v0 }
 0x2c4   :  { %1384 = vmatprep.subr.mxu1 %v1581_v0 }
 0x2c5   :  { %1385 = vmatpush3.msra.mxu1 %v771_v16 }
 0x2c6   :  { %1386 = vmatprep.subr.mxu1 %v1581_v0 }
 0x2c7   :  { %1387 = vmatpush3.msra.mxu1 %v770_v17 }
 0x2c8   :  { %1388 = vmatprep.subr.mxu1 %v1581_v0 }
 0x2c9   :  { %1389 = vmatpush3.msra.mxu1 %v769_v18 }
 0x2ca   :  { %1390 = vmatprep.subr.mxu1 %v1581_v0 }
 0x2cb   :  { %1391 = vmatpush3.msra.mxu1 %v768_v19 }
 0x2cc   :  { %1392 = vmatprep.subr.mxu1 %v1581_v0 }
 0x2cd   :  { %1393 = vmatpush3.msra.mxu1 %v767_v20 }
 0x2ce   :  { %1394 = vmatprep.subr.mxu1 %v1581_v0 }
 0x2cf   :  { %1395 = vmatpush3.msra.mxu1 %v766_v21 }
 0x2d0   :  { %1396 = vmatprep.subr.mxu1 %v1581_v0 }
 0x2d1   :  { %1397 = vmatpush3.msra.mxu1 %v765_v22 }
 0x2d2   :  { %1398 = vmatprep.subr.mxu1 %v1581_v0 }
 0x2d3   :  { %1399 = vmatpush3.msra.mxu1 %v764_v23 }
 0x2d4   :  { %1400 = vmatprep.subr.mxu1 %v1581_v0 }
 0x2d5   :  { %1401 = vmatpush3.msra.mxu1 %v763_v24 }
 0x2d6   :  { %1402 = vmatprep.subr.mxu1 %v1581_v0 }
 0x2d7   :  { %1403 = vmatpush3.msra.mxu1 %v762_v25 }
 0x2d8   :  { %1404 = vmatprep.subr.mxu1 %v1581_v0 }
 0x2d9   :  { %1405 = vmatpush3.msra.mxu1 %v761_v26 }
 0x2da   :  { %1406 = vmatprep.subr.mxu1 %v1581_v0 }
 0x2db   :  { %1407 = vmatpush3.msra.mxu1 %v760_v27 }
 0x2dc   :  { %1408 = vmatprep.subr.mxu1 %v1581_v0 }
 0x2dd   :  { %v751_v31 = vpop.f32.mrf.mxu0  ;;  %1409 = vmatpush3.msra.mxu1 %v759_v28 }
 0x2de   :  { %v752_v32 = vadd.f32 %v979_v29, %v751_v31  ;;  %1410 = vmatprep.subr.mxu1 %v1581_v0 }
 0x2df   :  { %v1381_v34 = vpop.f32.mrf.mxu0  ;;  %1411 = vmatpush3.msra.mxu1 %v758_v30 }
 0x2e0   :  { %v755_v35 = vmax.f32 %v752_v32, 0.0  ;;  %1412 = vmatprep.subr.mxu1 %v1581_v0 }
 0x2e1   :  { %1413 = vmatpush3.msra.mxu1 %v757_v33 }
 0x2e2   :  { %1415 = vmatmul.mubr.f32.vlgmr.msra.gmra.mxu1 %v755_v35 }
 0x382   :  { %v651_v53 = vpop.f32.mrf.mxu1 }
 0x383   :  { %v652_v54 = vadd.f32 %v977_v52, %v651_v53 }
 0x384   :  { %v1346_v55 = vpop.f32.mrf.mxu1 }
 0x385   :  { %1463 = vtanh.f32 %v652_v54 }
 0x392   :  { %v1464_v56 = vpop.eup %1463 }
 0x393   :  { %657 = vst [vmem:[#allocation10 + $0x8] sm:$0xff] %v1464_v56 }
 0x3a2   :  { %v847_v58 = vpop.f32.mrf.mxu1 }
 0x3a3   :  { %v848_v59 = vadd.f32 %v981_v57, %v847_v58 }
 0x3a4   :  { %v1416_v60 = vpop.f32.mrf.mxu1 }
 0x3a5   :  { %v851_v0 = vmax.f32 %v848_v59, 0.0 }
 0x3a7   :  { %1450 = vmatmul.mubr.f32.vlgmr.msra.gmra.mxu0 %v851_v0 }
 0x467   :  { %v943_v62 = vpop.f32.mrf.mxu0 }
 0x468   :  { %v944_v63 = vadd.f32 %v983_v61, %v943_v62 }
 0x469   :  { %v1451_v1 = vpop.f32.mrf.mxu0 }
 0x46a   :  { %1465 = vtanh.f32 %v944_v63 }
 0x477   :  { %v1466_v2 = vpop.eup %1465 }
 0x478   :  { %949 = vst [vmem:[#allocation10 + $0x10] sm:$0xff] %v1466_v2 }
 0x479   :  { %1558 = shalt.err (!%p1555_p10)
}
 0x47a   :  { %961 = dma.vmem_to_hbm [thread:$0]  %s956_s16, 384, %s1850_s7, [#allocation4], %s1577_s29, %s1577_s29, %s1578_s30  }
 0x47b   :  { %1573 = dma.done.wait [#allocation4], 384  }
 0x47c   :  { %1574 = vsyncadd [#allocation4], 4294966912 }
 0x47d   :  { %965 = vsyncpa [#allocation3], 1 }
 0x47e   :  { %966 = vsyncpa [#allocation6], 1 }
 0x47f   :  { %967 = vsyncpa [#allocation9], 1 }
 0x480   :  { %968 = vsyncpa [#allocation4], 1 }

</bundles_post_ra>
